<compile_context>
chip_gen: v6e
topology: v6e:2x2x1
jax: 0.10.0
libtpu: 0.0.40
codegen_flags: <defaults>
</compile_context>

<pallas_src>
import functools
import math

import numpy as np
import jax
import jax.numpy as jnp
from jax import lax
from jax.experimental import pallas as pl
from jax.experimental.pallas import tpu as pltpu

# ---- module hyper-parameters (defaults of `explainer`) ----
N_COMP    = 30           # channels C
N_FRAMES  = 20           # adaptive-pool output length F
N_CLASSES = 10
B         = 2            # batch
L_IN      = 40           # input temporal length (pooled down to N_FRAMES)

_LANE = 128
_SUBLANE = 8
_VMEM_BUDGET = 6 * 1024 * 1024   # stay well under 16 MiB default scoped VMEM (v5e)


def _round_up(a, b):
    return -(-a // b) * b


def _x_block_vmem_bytes(tb, cf, k):
    """VMEM footprint of a (tb, cf, k) f32 block under native (8,128) tiling."""
    return tb * _round_up(cf, _SUBLANE) * _round_up(k, _LANE) * 4


# ------------------------------ kernel ------------------------------

def _pool_linear_kernel(x_ref, w_ref, out_ref):
    """AdaptiveMaxPool1d + flatten + Linear(no bias) in one shot.

    x_ref   : (TB, C*F, k)      f32  x_ref[b, c*F+f, j] = j-th element of
                                     pooling window f of channel c
    w_ref   : (n_classes, C*F)  f32  native PyTorch fc1.weight layout
    out_ref : (TB, n_classes)   f32
    """
    pooled = jnp.max(x_ref[...], axis=-1)                 # (TB, C*F), window max
    out_ref[...] = lax.dot_general(
        pooled, w_ref[...],
        dimension_numbers=(((1,), (1,)), ((), ())),        # x @ W.T, no host transpose
        preferred_element_type=jnp.float32)


# ------------------------------ host-side helpers ------------------------------

def _padded_window_indices(L, F):
    """Static gather indices padding every AdaptiveMaxPool1d window to the max
    window length; padding repeats an in-window element so max() is unchanged."""
    starts = [(i * L) // F for i in range(F)]
    ends = [math.ceil((i + 1) * L / F) for i in range(F)]
    kmax = max(e - s for s, e in zip(starts, ends))
    idx = np.empty((F, kmax), dtype=np.int32)
    for i in range(F):
        last = ends[i] - starts[i] - 1
        for j in range(kmax):
            idx[i, j] = starts[i] + min(j, last)
    return idx.reshape(-1), kmax


@functools.partial(jax.jit, static_argnames=("n_frames",))
def explainer_forward(x, fc1_weight, *, n_frames=N_FRAMES):
    """x: (B, C, L) f32.  fc1_weight: (n_classes, C*F) f32 (PyTorch layout)."""
    Bx, C, L = x.shape
    n_classes, K = fc1_weight.shape
    F = n_frames
    assert K == C * F, "fc1 weight shape inconsistent with (C, N_FRAMES)"
    cf = C * F

    # Window-slab view of x: (B, C*F, k) with pooled[b, m] = max_j xview[b, m, j].
    if L % F == 0:
        k = L // F
        xview = x.reshape(Bx, cf, k)      # contiguous split -> pure view, no copy
    else:
        idx, k = _padded_window_indices(L, F)
        # One small gather, only on the non-uniform-window (non-default) path.
        xview = jnp.take(x, jnp.asarray(idx), axis=2).reshape(Bx, cf, k)

    cost = pl.CostEstimate(
        flops=2 * Bx * cf * n_classes + Bx * cf * k,
        transcendentals=0,
        bytes_accessed=4 * (Bx * cf * k + n_classes * cf + Bx * n_classes),
    )
    out_shape = jax.ShapeDtypeStruct((Bx, n_classes), jnp.float32)

    whole_bytes = _x_block_vmem_bytes(Bx, cf, k) + 2 * 4 * n_classes * cf
    if whole_bytes <= _VMEM_BUDGET:
        # Small batch (default B=2): single shot, no grid, no pipeline bookkeeping.
        return pl.pallas_call(
            _pool_linear_kernel,
            out_shape=out_shape,
            in_specs=[pl.BlockSpec(memory_space=pltpu.MemorySpace.VMEM),
                      pl.BlockSpec(memory_space=pltpu.MemorySpace.VMEM)],
            out_specs=pl.BlockSpec(memory_space=pltpu.MemorySpace.VMEM),
            cost_estimate=cost,
        )(xview, fc1_weight)

    # Large batch: tile the batch axis.  TB is (a) VMEM-budgeted (double-buffered
    # x blocks), (b) a multiple of 8, (c) small enough that the grid has >=2
    # "parallel" steps so both v7x TensorCores get work.
    per_row = _x_block_vmem_bytes(1, cf, k)
    tb_fit = max(8, min(128, (_VMEM_BUDGET // (2 * per_row)) // 8 * 8))
    tb = int(min(tb_fit, max(8, _round_up(-(-Bx // 2), 8))))
    grid = (pl.cdiv(Bx, tb),)
    return pl.pallas_call(
        _pool_linear_kernel,
        out_shape=out_shape,
        grid=grid,
        in_specs=[pl.BlockSpec((tb, cf, k), lambda b: (b, 0, 0)),
                  pl.BlockSpec((n_classes, cf), lambda b: (0, 0))],
        out_specs=pl.BlockSpec((tb, n_classes), lambda b: (b, 0)),
        compiler_params=pltpu.CompilerParams(dimension_semantics=("parallel",)),
        cost_estimate=cost,
    )(xview, fc1_weight)


def explainer_reference(x, fc1_weight, n_frames=N_FRAMES):
    """Pure-JAX/XLA reference of the PyTorch forward (for verification)."""
    Bx, C, L = x.shape
    F = n_frames
    cols = []
    for i in range(F):
        s = (i * L) // F
        e = math.ceil((i + 1) * L / F)
        cols.append(jnp.max(x[:, :, s:e], axis=-1, keepdims=True))
    pooled = jnp.concatenate(cols, axis=-1)              # (B, C, F)
    return pooled.reshape(Bx, C * F) @ fc1_weight.T


if __name__ == "__main__":
    key = jax.random.PRNGKey(0)
    kx, kw, kx2, kx3 = jax.random.split(key, 4)

    # Deterministic fc1 weight, mimicking nn.Linear default U(-1/sqrt(K), 1/sqrt(K)).
    K = N_COMP * N_FRAMES
    bound = 1.0 / math.sqrt(K)
    fc1_weight = jax.random.uniform(kw, (N_CLASSES, K), dtype=jnp.float32,
                                    minval=-bound, maxval=bound)

    # 1) Default shapes: uniform pooling windows (L % F == 0), single-shot path.
    x = jax.random.normal(kx, (B, N_COMP, L_IN), dtype=jnp.float32)
    out = jax.block_until_ready(explainer_forward(x, fc1_weight))
    ref = explainer_reference(x, fc1_weight)
    np.testing.assert_allclose(np.asarray(out), np.asarray(ref), rtol=1e-5, atol=1e-5)

    # 2) Non-uniform adaptive windows (L % F != 0): padded-window slab path.
    x2 = jax.random.normal(kx2, (B, N_COMP, 45), dtype=jnp.float32)
    out2 = jax.block_until_ready(explainer_forward(x2, fc1_weight))
    ref2 = explainer_reference(x2, fc1_weight)
    np.testing.assert_allclose(np.asarray(out2), np.asarray(ref2), rtol=1e-5, atol=1e-5)

    # 3) Larger batch: batched, megacore-parallel grid path.
    x3 = jax.random.normal(kx3, (64, N_COMP, L_IN), dtype=jnp.float32)
    out3 = jax.block_until_ready(explainer_forward(x3, fc1_weight))
    ref3 = explainer_reference(x3, fc1_weight)
    np.testing.assert_allclose(np.asarray(out3), np.asarray(ref3), rtol=1e-5, atol=1e-5)

    print("KERNEL_OK")
</pallas_src>

<mosaic_0001>
module attributes {stable_mosaic.version = 11 : i64} {
  func.func @_pool_linear_kernel(%arg0: memref<2x600x2xf32, #tpu.memory_space<vmem>>, %arg1: memref<10x600xf32, #tpu.memory_space<vmem>>, %arg2: memref<2x10xf32, #tpu.memory_space<vmem>>) attributes {dimension_semantics = [], scalar_prefetch = 0 : i64, scratch_operands = 0 : i64, tpu.core_type = #tpu.core_type<tc>} {
    %c0 = arith.constant 0 : index
    %c0_0 = arith.constant 0 : index
    %c0_1 = arith.constant 0 : index
    %0 = vector.load %arg0[%c0, %c0_0, %c0_1] : memref<2x600x2xf32, #tpu.memory_space<vmem>>, vector<2x600x2xf32>
    %cst = arith.constant dense<0xFF800000> : vector<2x600xf32>
    %1 = vector.multi_reduction <maximumf>, %0, %cst [2] : vector<2x600x2xf32> to vector<2x600xf32>
    %c0_2 = arith.constant 0 : index
    %c0_3 = arith.constant 0 : index
    %2 = vector.load %arg1[%c0_2, %c0_3] : memref<10x600xf32, #tpu.memory_space<vmem>>, vector<10x600xf32>
    %cst_4 = arith.constant dense<0.000000e+00> : vector<2x10xf32>
    %3 = tpu.matmul %1, %2, %cst_4 {dimension_numbers = #tpu.dot_dimension_numbers<[1], [1], [0], [0], [0, 0, 1, 0], [], []>} : vector<2x600xf32>, vector<10x600xf32>, vector<2x10xf32> -> vector<2x10xf32>
    %c0_5 = arith.constant 0 : index
    %c0_6 = arith.constant 0 : index
    %4 = vector.load %arg2[%c0_5, %c0_6] : memref<2x10xf32, #tpu.memory_space<vmem>>, vector<2x10xf32>
    tpu.vector_store %arg2[%c0_5, %c0_6], %3 {strides = array<i32>} : memref<2x10xf32, #tpu.memory_space<vmem>>, vector<2x10xf32>,
    return
  }
}

</mosaic_0001>

<bundles_post_ra>
// kernel: explainer_forward.1
= control target key start
LH: loop header
LB: loop body
LE: loop exit
PB: predicated region body
PF: predicated region fallthrough
CT: control target
= control target key end

     0   :  { %vm162_vm0 = vcmask 15360   ;;  %s2956_s0 = inlined_call_operand.vmem [shape: f32[2,600,2], index: 0, kind: input, shape index: {}]   ;;  %s2957_s1 = inlined_call_operand.vmem [shape: f32[10,600], index: 1, kind: input, shape index: {}]   ;;  %s2958_s2 = inlined_call_operand.hbm [shape: f32[2,10], index: 2, kind: output, shape index: {}]  }
   0x1   :  { %v14_v0 = vld [vmem:[%s2956_s0 + $0x10] sm:$0xff]  ;;  %v12_v1 = vld [vmem:[%s2956_s0] sm:$0xff]  ;;  %v15_v2 = vld [vmem:[%s2956_s0 + $0x18] sm:$0xff] }
   0x2   :  { %v169_v3 = vsel %vm162_vm0, %v14_v0, -inf  ;;  %v163_v4 = vsel %vm162_vm0, %v12_v1, -inf  ;;  %v13_v5 = vld [vmem:[%s2956_s0 + $0x8] sm:$0xff]  ;;  %v172_v6 = vsel %vm162_vm0, %v15_v2, -inf  ;;  %v28_v9 = vld [vmem:[%s2956_s0 + $0x80] sm:$0xff]  ;;  %v103_v13 = vld [vmem:[%s2956_s0 + $0x2d8] sm:$0xff] }
   0x3   :  { %170 = vmax.xlane.f32.xlu1 %v169_v3  ;;  %164 = vmax.xlane.f32.xlu0 %v163_v4  ;;  %v166_v7 = vsel %vm162_vm0, %v13_v5, -inf  ;;  %v29_v8 = vld [vmem:[%s2956_s0 + $0x88] sm:$0xff]  ;;  %v211_v11 = vsel %vm162_vm0, %v28_v9, -inf  ;;  %v104_v12 = vld [vmem:[%s2956_s0 + $0x2e0] sm:$0xff]  ;;  %v436_v15 = vsel %vm162_vm0, %v103_v13, -inf  ;;  %v87_v16 = vld [vmem:[%s2956_s0 + $0x258] sm:$0xff] }
   0x4   :  { %v214_v10 = vsel %vm162_vm0, %v29_v8, -inf  ;;  %v439_v14 = vsel %vm162_vm0, %v104_v12, -inf  ;;  %v30_v17 = vld [vmem:[%s2956_s0 + $0x90] sm:$0xff]  ;;  %v388_v18 = vsel %vm162_vm0, %v87_v16, -inf  ;;  %v105_v20 = vld [vmem:[%s2956_s0 + $0x2e8] sm:$0xff]  ;;  %v88_v21 = vld [vmem:[%s2956_s0 + $0x260] sm:$0xff] }
   0x5   :  { %v217_v19 = vsel %vm162_vm0, %v30_v17, -inf  ;;  %v442_v22 = vsel %vm162_vm0, %v105_v20, -inf  ;;  %v391_v23 = vsel %vm162_vm0, %v88_v21, -inf  ;;  %v89_v24 = vld [vmem:[%s2956_s0 + $0x268] sm:$0xff]  ;;  %v31_v25 = vld [vmem:[%s2956_s0 + $0x98] sm:$0xff]  ;;  %v32_v28 = vld [vmem:[%s2956_s0 + $0xa0] sm:$0xff] }
   0x6   :  { %v394_v26 = vsel %vm162_vm0, %v89_v24, -inf  ;;  %v220_v27 = vsel %vm162_vm0, %v31_v25, -inf  ;;  %v106_v29 = vld [vmem:[%s2956_s0 + $0x2f0] sm:$0xff]  ;;  %v223_v30 = vsel %vm162_vm0, %v32_v28, -inf }
   0x7   :  { %173 = vmax.xlane.f32.xlu1 %v172_v6  ;;  %167 = vmax.xlane.f32.xlu0 %v166_v7  ;;  %v445_v31 = vsel %vm162_vm0, %v106_v29, -inf }
   0xb   :  { %215 = vmax.xlane.f32.xlu1 %v214_v10  ;;  %212 = vmax.xlane.f32.xlu0 %v211_v11 }
   0xf   :  { %440 = vmax.xlane.f32.xlu1 %v439_v14  ;;  %437 = vmax.xlane.f32.xlu0 %v436_v15 }
  0x13   :  { %389 = vmax.xlane.f32.xlu1 %v388_v18  ;;  %218 = vmax.xlane.f32.xlu0 %v217_v19 }
  0x17   :  { %443 = vmax.xlane.f32.xlu1 %v442_v22  ;;  %392 = vmax.xlane.f32.xlu0 %v391_v23 }
  0x1b   :  { %395 = vmax.xlane.f32.xlu1 %v394_v26  ;;  %221 = vmax.xlane.f32.xlu0 %v220_v27 }
  0x1c   :  { %7 = vsyncpa [#allocation3], 0  ;;  %v107_v32 = vld [vmem:[%s2956_s0 + $0x2f8] sm:$0xff]  ;;  %v90_v33 = vld [vmem:[%s2956_s0 + $0x270] sm:$0xff]  ;;  %vm784_vm1 = vcmask 130112   ;;  %vm791_vm2 = vcmask 195712  }
  0x1d   :  { %v448_v34 = vsel %vm162_vm0, %v107_v32, -inf  ;;  %v397_v35 = vsel %vm162_vm0, %v90_v33, -inf  ;;  %v33_v36 = vld [vmem:[%s2956_s0 + $0xa8] sm:$0xff]  ;;  %v16_v37 = vld [vmem:[%s2956_s0 + $0x20] sm:$0xff]  ;;  %v91_v41 = vld [vmem:[%s2956_s0 + $0x278] sm:$0xff]  ;;  %vm798_vm3 = vcmask 261312  }
  0x1e   :  { %v226_v38 = vsel %vm162_vm0, %v33_v36, -inf  ;;  %v175_v39 = vsel %vm162_vm0, %v16_v37, -inf  ;;  %v108_v40 = vld [vmem:[%s2956_s0 + $0x300] sm:$0xff]  ;;  %v400_v43 = vsel %vm162_vm0, %v91_v41, -inf  ;;  %v34_v44 = vld [vmem:[%s2956_s0 + $0xb0] sm:$0xff]  ;;  %v17_v45 = vld [vmem:[%s2956_s0 + $0x28] sm:$0xff] }
  0x1f   :  { %224 = vmax.xlane.f32.xlu1 %v223_v30  ;;  %446 = vmax.xlane.f32.xlu0 %v445_v31  ;;  %v451_v42 = vsel %vm162_vm0, %v108_v40, -inf  ;;  %v229_v46 = vsel %vm162_vm0, %v34_v44, -inf  ;;  %v178_v47 = vsel %vm162_vm0, %v17_v45, -inf  ;;  %v61_v48 = vld [vmem:[%s2956_s0 + $0x188] sm:$0xff]  ;;  %v60_v49 = vld [vmem:[%s2956_s0 + $0x180] sm:$0xff]  ;;  %v135_v57 = vld [vmem:[%s2956_s0 + $0x3d8] sm:$0xff] }
  0x20   :  { %v310_v50 = vsel %vm162_vm0, %v61_v48, -inf  ;;  %v307_v51 = vsel %vm162_vm0, %v60_v49, -inf  ;;  %v109_v52 = vld [vmem:[%s2956_s0 + $0x308] sm:$0xff]  ;;  %v92_v53 = vld [vmem:[%s2956_s0 + $0x280] sm:$0xff]  ;;  %v532_v59 = vsel %vm162_vm0, %v135_v57, -inf  ;;  %v35_v60 = vld [vmem:[%s2956_s0 + $0xb8] sm:$0xff] }
  0x21   :  { %v454_v54 = vsel %vm162_vm0, %v109_v52, -inf  ;;  %v403_v55 = vsel %vm162_vm0, %v92_v53, -inf  ;;  %v136_v56 = vld [vmem:[%s2956_s0 + $0x3e0] sm:$0xff]  ;;  %v18_v61 = vld [vmem:[%s2956_s0 + $0x30] sm:$0xff]  ;;  %v232_v62 = vsel %vm162_vm0, %v35_v60, -inf  ;;  %v45_v0 = vld [vmem:[%s2956_s0 + $0x108] sm:$0xff] }
  0x22   :  { %v535_v58 = vsel %vm162_vm0, %v136_v56, -inf  ;;  %v181_v63 = vsel %vm162_vm0, %v18_v61, -inf  ;;  %v44_v1 = vld [vmem:[%s2956_s0 + $0x100] sm:$0xff]  ;;  %v262_v2 = vsel %vm162_vm0, %v45_v0, -inf  ;;  %v93_v4 = vld [vmem:[%s2956_s0 + $0x288] sm:$0xff]  ;;  %v62_v5 = vld [vmem:[%s2956_s0 + $0x190] sm:$0xff] }
  0x23   :  { %449 = vmax.xlane.f32.xlu1 %v448_v34  ;;  %398 = vmax.xlane.f32.xlu0 %v397_v35  ;;  %v259_v3 = vsel %vm162_vm0, %v44_v1, -inf  ;;  %v406_v6 = vsel %vm162_vm0, %v93_v4, -inf  ;;  %v313_v7 = vsel %vm162_vm0, %v62_v5, -inf  ;;  %v119_v8 = vld [vmem:[%s2956_s0 + $0x358] sm:$0xff]  ;;  %v110_v9 = vld [vmem:[%s2956_s0 + $0x310] sm:$0xff]  ;;  %v137_v12 = vld [vmem:[%s2956_s0 + $0x3e8] sm:$0xff] }
  0x24   :  { %v484_v10 = vsel %vm162_vm0, %v119_v8, -inf  ;;  %v457_v11 = vsel %vm162_vm0, %v110_v9, -inf  ;;  %v120_v13 = vld [vmem:[%s2956_s0 + $0x360] sm:$0xff]  ;;  %v538_v14 = vsel %vm162_vm0, %v137_v12, -inf  ;;  %v19_v17 = vld [vmem:[%s2956_s0 + $0x38] sm:$0xff]  ;;  %v46_v21 = vld [vmem:[%s2956_s0 + $0x110] sm:$0xff] }
  0x25   :  { %v487_v15 = vsel %vm162_vm0, %v120_v13, -inf  ;;  %v36_v16 = vld [vmem:[%s2956_s0 + $0xc0] sm:$0xff]  ;;  %v184_v19 = vsel %vm162_vm0, %v19_v17, -inf  ;;  %v63_v20 = vld [vmem:[%s2956_s0 + $0x198] sm:$0xff]  ;;  %v265_v23 = vsel %vm162_vm0, %v46_v21, -inf  ;;  %v94_v25 = vld [vmem:[%s2956_s0 + $0x290] sm:$0xff] }
  0x26   :  { %v235_v18 = vsel %vm162_vm0, %v36_v16, -inf  ;;  %v316_v22 = vsel %vm162_vm0, %v63_v20, -inf  ;;  %v111_v24 = vld [vmem:[%s2956_s0 + $0x318] sm:$0xff]  ;;  %v409_v27 = vsel %vm162_vm0, %v94_v25, -inf  ;;  %v138_v28 = vld [vmem:[%s2956_s0 + $0x3f0] sm:$0xff]  ;;  %v121_v29 = vld [vmem:[%s2956_s0 + $0x368] sm:$0xff] }
  0x27   :  { %227 = vmax.xlane.f32.xlu1 %v226_v38  ;;  %176 = vmax.xlane.f32.xlu0 %v175_v39  ;;  %v460_v26 = vsel %vm162_vm0, %v111_v24, -inf  ;;  %v541_v30 = vsel %vm162_vm0, %v138_v28, -inf  ;;  %v490_v31 = vsel %vm162_vm0, %v121_v29, -inf  ;;  %v37_v32 = vld [vmem:[%s2956_s0 + $0xc8] sm:$0xff]  ;;  %v20_v33 = vld [vmem:[%s2956_s0 + $0x40] sm:$0xff]  ;;  %v47_v37 = vld [vmem:[%s2956_s0 + $0x118] sm:$0xff] }
  0x28   :  { %v238_v34 = vsel %vm162_vm0, %v37_v32, -inf  ;;  %v187_v35 = vsel %vm162_vm0, %v20_v33, -inf  ;;  %v64_v36 = vld [vmem:[%s2956_s0 + $0x1a0] sm:$0xff]  ;;  %v268_v39 = vsel %vm162_vm0, %v47_v37, -inf  ;;  %v95_v41 = vld [vmem:[%s2956_s0 + $0x298] sm:$0xff]  ;;  %v122_v45 = vld [vmem:[%s2956_s0 + $0x370] sm:$0xff] }
  0x29   :  { %v319_v38 = vsel %vm162_vm0, %v64_v36, -inf  ;;  %v112_v40 = vld [vmem:[%s2956_s0 + $0x320] sm:$0xff]  ;;  %v139_v44 = vld [vmem:[%s2956_s0 + $0x3f8] sm:$0xff]  ;;  %v38_v48 = vld [vmem:[%s2956_s0 + $0xd0] sm:$0xff]  ;;  %vm805_vm4 = vcmask 326912   ;;  %vm812_vm5 = vcmask 392512  }
  0x2a   :  { %v21_v49 = vld [vmem:[%s2956_s0 + $0x48] sm:$0xff]  ;;  %v48_v53 = vld [vmem:[%s2956_s0 + $0x120] sm:$0xff]  ;;  %v123_v61 = vld [vmem:[%s2956_s0 + $0x378] sm:$0xff]  ;;  %vm819_vm6 = vcmask 458112   ;;  %vm826_vm7 = vcmask 523712   ;;  %vm833_vm8 = vcmask 589312  }
  0x2b   :  { %452 = vmax.xlane.f32.xlu1 %v451_v42  ;;  %401 = vmax.xlane.f32.xlu0 %v400_v43  ;;  %v463_v42 = vsel %vm162_vm0, %v112_v40, -inf  ;;  %v412_v43 = vsel %vm162_vm0, %v95_v41, -inf  ;;  %v65_v52 = vld [vmem:[%s2956_s0 + $0x1a8] sm:$0xff]  ;;  %v96_v57 = vld [vmem:[%s2956_s0 + $0x2a0] sm:$0xff]  ;;  %v39_v0 = vld [vmem:[%s2956_s0 + $0xd8] sm:$0xff]  ;;  %vm840_vm9 = vcmask 654912  }
  0x2c   :  { %v113_v56 = vld [vmem:[%s2956_s0 + $0x328] sm:$0xff]  ;;  %v140_v60 = vld [vmem:[%s2956_s0 + $0x400] sm:$0xff]  ;;  %v22_v1 = vld [vmem:[%s2956_s0 + $0x50] sm:$0xff]  ;;  %vm847_vm10 = vcmask 720512   ;;  %vm854_vm11 = vcmask 786112   ;;  %vm861_vm12 = vcmask 851712  }
  0x2d   :  { %v66_v4 = vld [vmem:[%s2956_s0 + $0x1b0] sm:$0xff]  ;;  %v49_v5 = vld [vmem:[%s2956_s0 + $0x128] sm:$0xff]  ;;  %v124_v16 = vld [vmem:[%s2956_s0 + $0x380] sm:$0xff]  ;;  %vm868_vm13 = vcmask 917312   ;;  %vm875_vm14 = vcmask 982912   ;;  %vm882_vm15 = vcmask 1048512  }
  0x2e   :  { %v274_v8 = vsel %vm162_vm0, %v49_v5, -inf  ;;  %v114_v9 = vld [vmem:[%s2956_s0 + $0x330] sm:$0xff]  ;;  %v67_v36 = vld [vmem:[%s2956_s0 + $0x1b8] sm:$0xff] }
  0x2f   :  { %230 = vmax.xlane.f32.xlu1 %v229_v46  ;;  %179 = vmax.xlane.f32.xlu0 %v178_v47  ;;  %v544_v46 = vsel %vm162_vm0, %v139_v44, -inf  ;;  %v493_v47 = vsel %vm162_vm0, %v122_v45, -inf  ;;  %v469_v12 = vsel %vm162_vm0, %v114_v9, -inf  ;;  %v50_v37 = vld [vmem:[%s2956_s0 + $0x130] sm:$0xff]  ;;  %v328_v44 = vsel %vm162_vm0, %v67_v36, -inf }
  0x30   :  { %v277_v45 = vsel %vm162_vm0, %v50_v37, -inf }
  0x33   :  { %311 = vmax.xlane.f32.xlu1 %v310_v50  ;;  %308 = vmax.xlane.f32.xlu0 %v307_v51  ;;  %v241_v50 = vsel %vm162_vm0, %v38_v48, -inf  ;;  %v190_v51 = vsel %vm162_vm0, %v21_v49, -inf  ;;  %v115_v48 = vld [vmem:[%s2956_s0 + $0x338] sm:$0xff]  ;;  %v98_v49 = vld [vmem:[%s2956_s0 + $0x2b0] sm:$0xff] }
  0x37   :  { %455 = vmax.xlane.f32.xlu1 %v454_v54  ;;  %404 = vmax.xlane.f32.xlu0 %v403_v55  ;;  %v322_v54 = vsel %vm162_vm0, %v65_v52, -inf  ;;  %v271_v55 = vsel %vm162_vm0, %v48_v53, -inf }
  0x3b   :  { %536 = vmax.xlane.f32.xlu1 %v535_v58  ;;  %533 = vmax.xlane.f32.xlu0 %v532_v59  ;;  %v466_v58 = vsel %vm162_vm0, %v113_v56, -inf  ;;  %v415_v59 = vsel %vm162_vm0, %v96_v57, -inf }
  0x3f   :  { %233 = vmax.xlane.f32.xlu1 %v232_v62  ;;  %182 = vmax.xlane.f32.xlu0 %v181_v63  ;;  %v547_v62 = vsel %vm162_vm0, %v140_v60, -inf  ;;  %v496_v63 = vsel %vm162_vm0, %v123_v61, -inf }
  0x43   :  { %263 = vmax.xlane.f32.xlu1 %v262_v2  ;;  %260 = vmax.xlane.f32.xlu0 %v259_v3  ;;  %v244_v2 = vsel %vm162_vm0, %v39_v0, -inf  ;;  %v193_v3 = vsel %vm162_vm0, %v22_v1, -inf }
  0x47   :  { %407 = vmax.xlane.f32.xlu1 %v406_v6  ;;  %314 = vmax.xlane.f32.xlu0 %v313_v7  ;;  %v773_v6 = vlaneseq  ;;  %v325_v7 = vsel %vm162_vm0, %v66_v4, -inf }
  0x4b   :  { %485 = vmax.xlane.f32.xlu1 %v484_v10  ;;  %458 = vmax.xlane.f32.xlu0 %v457_v11  ;;  %v97_v10 = vld [vmem:[%s2956_s0 + $0x2a8] sm:$0xff]  ;;  %v2124_v11 = vand.u32 127, %v773_v6 }
  0x4c   :  { %v418_v13 = vsel %vm162_vm0, %v97_v10, -inf }
  0x4d   :  { %v779_v17 = vadd.s32 4294967288, %v2124_v11 }
  0x4f   :  { %539 = vmax.xlane.f32.xlu1 %v538_v14  ;;  %488 = vmax.xlane.f32.xlu0 %v487_v15  ;;  %v2128_v14 = vshrl.u32 %v773_v6, 7  ;;  %v141_v15 = vld [vmem:[%s2956_s0 + $0x408] sm:$0xff] }
  0x51   :  { %v2143_v24 = vsub.s32 %v2124_v11, %v2128_v14  ;;  %v2146_v25 = vsub.s32 %v779_v17, %v2128_v14 }
  0x53   :  { %236 = vmax.xlane.f32.xlu1 %v235_v18  ;;  %185 = vmax.xlane.f32.xlu0 %v184_v19  ;;  %v786_v18 = vadd.s32 4294967280, %v2124_v11  ;;  %v793_v19 = vadd.s32 4294967272, %v2124_v11 }
  0x55   :  { %v2155_v28 = vsub.s32 %v786_v18, %v2128_v14  ;;  %v2158_v29 = vsub.s32 %v793_v19, %v2128_v14 }
  0x57   :  { %317 = vmax.xlane.f32.xlu1 %v316_v22  ;;  %266 = vmax.xlane.f32.xlu0 %v265_v23  ;;  %v550_v22 = vsel %vm162_vm0, %v141_v15, -inf  ;;  %v499_v23 = vsel %vm162_vm0, %v124_v16, -inf  ;;  %v51_v15 = vld [vmem:[%s2956_s0 + $0x138] sm:$0xff]  ;;  %v800_v16 = vadd.s32 4294967264, %v2124_v11 }
  0x5b   :  { %461 = vmax.xlane.f32.xlu1 %v460_v26  ;;  %410 = vmax.xlane.f32.xlu0 %v409_v27  ;;  %v40_v26 = vld [vmem:[%s2956_s0 + $0xe0] sm:$0xff]  ;;  %v23_v27 = vld [vmem:[%s2956_s0 + $0x58] sm:$0xff] }
  0x5c   :  { %v247_v32 = vsel %vm162_vm0, %v40_v26, -inf  ;;  %v196_v33 = vsel %vm162_vm0, %v23_v27, -inf  ;;  %v2228_v27 = vsub.s32 %v800_v16, %v2128_v14 }
  0x5f   :  { %542 = vmax.xlane.f32.xlu1 %v541_v30  ;;  %491 = vmax.xlane.f32.xlu0 %v490_v31 }
  0x63   :  { %239 = vmax.xlane.f32.xlu1 %v238_v34  ;;  %188 = vmax.xlane.f32.xlu0 %v187_v35 }
  0x67   :  { %320 = vmax.xlane.f32.xlu1 %v319_v38  ;;  %269 = vmax.xlane.f32.xlu0 %v268_v39 }
  0x6b   :  { %464 = vmax.xlane.f32.xlu1 %v463_v42  ;;  %413 = vmax.xlane.f32.xlu0 %v412_v43 }
  0x6f   :  { %545 = vmax.xlane.f32.xlu1 %v544_v46  ;;  %494 = vmax.xlane.f32.xlu0 %v493_v47 }
  0x73   :  { %242 = vmax.xlane.f32.xlu1 %v241_v50  ;;  %191 = vmax.xlane.f32.xlu0 %v190_v51 }
  0x77   :  { %323 = vmax.xlane.f32.xlu1 %v322_v54  ;;  %272 = vmax.xlane.f32.xlu0 %v271_v55  ;;  %v472_v54 = vsel %vm162_vm0, %v115_v48, -inf  ;;  %v421_v55 = vsel %vm162_vm0, %v98_v49, -inf }
  0x7b   :  { %467 = vmax.xlane.f32.xlu1 %v466_v58  ;;  %416 = vmax.xlane.f32.xlu0 %v415_v59  ;;  %v142_v58 = vld [vmem:[%s2956_s0 + $0x410] sm:$0xff]  ;;  %v125_v59 = vld [vmem:[%s2956_s0 + $0x388] sm:$0xff] }
  0x7c   :  { %v502_v0 = vsel %vm162_vm0, %v125_v59, -inf }
  0x7f   :  { %548 = vmax.xlane.f32.xlu1 %v547_v62  ;;  %497 = vmax.xlane.f32.xlu0 %v496_v63  ;;  %v553_v63 = vsel %vm162_vm0, %v142_v58, -inf }
  0x83   :  { %245 = vmax.xlane.f32.xlu1 %v244_v2  ;;  %194 = vmax.xlane.f32.xlu0 %v193_v3  ;;  %v41_v2 = vld [vmem:[%s2956_s0 + $0xe8] sm:$0xff]  ;;  %v24_v3 = vld [vmem:[%s2956_s0 + $0x60] sm:$0xff] }
  0x87   :  { %326 = vmax.xlane.f32.xlu1 %v325_v7  ;;  %275 = vmax.xlane.f32.xlu0 %v274_v8  ;;  %v250_v7 = vsel %vm162_vm0, %v41_v2, -inf  ;;  %v199_v8 = vsel %vm162_vm0, %v24_v3, -inf }
  0x8b   :  { %470 = vmax.xlane.f32.xlu1 %v469_v12  ;;  %419 = vmax.xlane.f32.xlu0 %v418_v13  ;;  %v68_v13 = vld [vmem:[%s2956_s0 + $0x1c0] sm:$0xff] }
  0x8c   :  { %v171_v20 = vpop.xlane.xlu1 %170  ;;  %v165_v21 = vpop.xlane.xlu0 %164 }
  0x8d   :  { %v778_v34 = vrot.slane %v165_v21, %v2143_v24  ;;  %v790_v38 = vrot.slane %v171_v20, %v2155_v28  ;;  %v331_v21 = vsel %vm162_vm0, %v68_v13, -inf }
  0x8f   :  { %551 = vmax.xlane.f32.xlu1 %v550_v22  ;;  %500 = vmax.xlane.f32.xlu0 %v499_v23  ;;  %v280_v22 = vsel %vm162_vm0, %v51_v15, -inf }
  0x90   :  { %v174_v30 = vpop.xlane.xlu1 %173  ;;  %v168_v31 = vpop.xlane.xlu0 %167 }
  0x91   :  { %v783_v35 = vrot.slane %v168_v31, %v2146_v25  ;;  %v797_v39 = vrot.slane %v174_v30, %v2158_v29  ;;  %v116_v30 = vld [vmem:[%s2956_s0 + $0x340] sm:$0xff]  ;;  %v99_v31 = vld [vmem:[%s2956_s0 + $0x2b8] sm:$0xff] }
  0x92   :  { %v475_v36 = vsel %vm162_vm0, %v116_v30, -inf  ;;  %v424_v37 = vsel %vm162_vm0, %v99_v31, -inf }
  0x93   :  { %v785_v40 = vsel %vm784_vm1, %v783_v35, %v778_v34  ;;  %248 = vmax.xlane.f32.xlu1 %v247_v32  ;;  %197 = vmax.xlane.f32.xlu0 %v196_v33 }
  0x94   :  { %v792_v41 = vsel %vm791_vm2, %v790_v38, %v785_v40  ;;  %v216_v42 = vpop.xlane.xlu1 %215  ;;  %v213_v43 = vpop.xlane.xlu0 %212  ;;  %v143_v40 = vld [vmem:[%s2956_s0 + $0x418] sm:$0xff] }
  0x95   :  { %v891_v46 = vrot.slane %v216_v42, %v2146_v25  ;;  %v887_v47 = vrot.slane %v213_v43, %v2143_v24  ;;  %v2185_v50 = vsel %vm798_vm3, %v797_v39, %v792_v41  ;;  %v126_v41 = vld [vmem:[%s2956_s0 + $0x390] sm:$0xff]  ;;  %v807_v42 = vadd.s32 4294967256, %v2124_v11 }
  0x96   :  { %v505_v48 = vsel %vm162_vm0, %v126_v41, -inf }
  0x97   :  { %v892_v51 = vsel %vm784_vm1, %v891_v46, %v887_v47  ;;  %329 = vmax.xlane.f32.xlu1 %v328_v44  ;;  %278 = vmax.xlane.f32.xlu0 %v277_v45  ;;  %v556_v47 = vsel %vm162_vm0, %v143_v40, -inf }
  0x98   :  { %v441_v52 = vpop.xlane.xlu1 %440  ;;  %v438_v53 = vpop.xlane.xlu0 %437 }
  0x99   :  { %v1261_v56 = vrot.slane %v441_v52, %v2146_v25  ;;  %v1257_v57 = vrot.slane %v438_v53, %v2143_v24  ;;  %v2256_v52 = vsub.s32 %v807_v42, %v2128_v14  ;;  %v42_v53 = vld [vmem:[%s2956_s0 + $0xf0] sm:$0xff] }
  0x9a   :  { %v253_v59 = vsel %vm162_vm0, %v42_v53, -inf }
  0x9b   :  { %v1262_v60 = vsel %vm784_vm1, %v1261_v56, %v1257_v57  ;;  %473 = vmax.xlane.f32.xlu1 %v472_v54  ;;  %422 = vmax.xlane.f32.xlu0 %v421_v55  ;;  %v25_v54 = vld [vmem:[%s2956_s0 + $0x68] sm:$0xff] }
  0x9c   :  { %v390_v61 = vpop.xlane.xlu1 %389  ;;  %v219_v62 = vpop.xlane.xlu0 %218 }
  0x9d   :  { %v896_v1 = vrot.slane %v219_v62, %v2155_v28  ;;  %v1178_v9 = vrot.slane %v390_v61, %v2143_v24 }
  0x9f   :  { %v897_v4 = vsel %vm791_vm2, %v896_v1, %v892_v51  ;;  %554 = vmax.xlane.f32.xlu1 %v553_v63  ;;  %503 = vmax.xlane.f32.xlu0 %v502_v0  ;;  %v69_v63 = vld [vmem:[%s2956_s0 + $0x1c8] sm:$0xff]  ;;  %v52_v0 = vld [vmem:[%s2956_s0 + $0x140] sm:$0xff]  ;;  %v814_v1 = vadd.s32 4294967248, %v2124_v11 }
  0xa0   :  { %v444_v5 = vpop.xlane.xlu1 %443  ;;  %v393_v6 = vpop.xlane.xlu0 %392 }
  0xa1   :  { %v1266_v10 = vrot.slane %v444_v5, %v2155_v28  ;;  %v1182_v12 = vrot.slane %v393_v6, %v2146_v25  ;;  %v334_v6 = vsel %vm162_vm0, %v69_v63, -inf }
  0xa3   :  { %v1267_v17 = vsel %vm791_vm2, %v1266_v10, %v1262_v60  ;;  %v1183_v18 = vsel %vm784_vm1, %v1182_v12, %v1178_v9  ;;  %251 = vmax.xlane.f32.xlu1 %v250_v7  ;;  %200 = vmax.xlane.f32.xlu0 %v199_v8  ;;  %v202_v60 = vsel %vm162_vm0, %v25_v54, -inf  ;;  %v283_v7 = vsel %vm162_vm0, %v52_v0, -inf  ;;  %v77_v12 = vld [vmem:[%s2956_s0 + $0x208] sm:$0xff] }
  0xa4   :  { %v396_v19 = vpop.xlane.xlu1 %395  ;;  %v222_v20 = vpop.xlane.xlu0 %221  ;;  %v2285_v10 = vsub.s32 %v814_v1, %v2128_v14 }
  0xa5   :  { %v1187_v23 = vrot.slane %v396_v19, %v2155_v28  ;;  %v901_v26 = vrot.slane %v222_v20, %v2158_v29 }
  0xa7   :  { %v1188_v32 = vsel %vm791_vm2, %v1187_v23, %v1183_v18  ;;  %v902_v33 = vsel %vm798_vm3, %v901_v26, %v897_v4  ;;  %332 = vmax.xlane.f32.xlu1 %v331_v21  ;;  %281 = vmax.xlane.f32.xlu0 %v280_v22  ;;  %v358_v18 = vsel %vm162_vm0, %v77_v12, -inf  ;;  %v117_v22 = vld [vmem:[%s2956_s0 + $0x348] sm:$0xff]  ;;  %v100_v23 = vld [vmem:[%s2956_s0 + $0x2c0] sm:$0xff] }
  0xa8   :  { %v225_v34 = vpop.xlane.xlu1 %224  ;;  %v447_v35 = vpop.xlane.xlu0 %446 }
  0xa9   :  { %v906_v38 = vrot.slane %v225_v34, %v2228_v27  ;;  %v1271_v39 = vrot.slane %v447_v35, %v2158_v29  ;;  %v427_v34 = vsel %vm162_vm0, %v100_v23, -inf }
  0xab   :  { %v907_v43 = vsel %vm805_vm4, %v906_v38, %v902_v33  ;;  %v1272_v44 = vsel %vm798_vm3, %v1271_v39, %v1267_v17  ;;  %476 = vmax.xlane.f32.xlu1 %v475_v36  ;;  %425 = vmax.xlane.f32.xlu0 %v424_v37  ;;  %v478_v33 = vsel %vm162_vm0, %v117_v22, -inf  ;;  %v144_v37 = vld [vmem:[%s2956_s0 + $0x420] sm:$0xff]  ;;  %v127_v38 = vld [vmem:[%s2956_s0 + $0x398] sm:$0xff] }
  0xac   :  { %v450_v45 = vpop.xlane.xlu1 %449  ;;  %v399_v46 = vpop.xlane.xlu0 %398  ;;  %v559_v42 = vsel %vm162_vm0, %v144_v37, -inf }
  0xad   :  { %v1276_v49 = vrot.slane %v450_v45, %v2228_v27  ;;  %v1192_v51 = vrot.slane %v399_v46, %v2158_v29  ;;  %v152_v46 = vld [vmem:[%s2956_s0 + $0x460] sm:$0xff] }
  0xaf   :  { %v1277_v55 = vsel %vm805_vm4, %v1276_v49, %v1272_v44  ;;  %v1193_v56 = vsel %vm798_vm3, %v1192_v51, %v1188_v32  ;;  %557 = vmax.xlane.f32.xlu1 %v556_v47  ;;  %506 = vmax.xlane.f32.xlu0 %v505_v48  ;;  %v151_v47 = vld [vmem:[%s2956_s0 + $0x458] sm:$0xff]  ;;  %v821_v48 = vadd.s32 4294967240, %v2124_v11 }
  0xb0   :  { %v228_v57 = vpop.xlane.xlu1 %227  ;;  %v177_v58 = vpop.xlane.xlu0 %176 }
  0xb1   :  { %v911_v61 = vrot.slane %v228_v57, %v2256_v52  ;;  %v804_v62 = vrot.slane %v177_v58, %v2228_v27 }
  0xb3   :  { %v912_v2 = vsel %vm812_vm5, %v911_v61, %v907_v43  ;;  %v806_v3 = vsel %vm805_vm4, %v804_v62, %v2185_v50  ;;  %254 = vmax.xlane.f32.xlu1 %v253_v59  ;;  %203 = vmax.xlane.f32.xlu0 %v202_v60  ;;  %v76_v50 = vld [vmem:[%s2956_s0 + $0x200] sm:$0xff]  ;;  %v508_v43 = vsel %vm162_vm0, %v127_v38, -inf  ;;  %v2336_v59 = vsub.s32 %v821_v48, %v2128_v14  ;;  %v43_v60 = vld [vmem:[%s2956_s0 + $0xf8] sm:$0xff]  ;;  %v26_v61 = vld [vmem:[%s2956_s0 + $0x70] sm:$0xff] }
  0xb4   :  { %v453_v4 = vpop.xlane.xlu1 %452  ;;  %v402_v5 = vpop.xlane.xlu0 %401  ;;  %v355_v19 = vsel %vm162_vm0, %v76_v50, -inf  ;;  %v256_v1 = vsel %vm162_vm0, %v43_v60, -inf }
  0xb5   :  { %v1281_v8 = vrot.slane %v453_v4, %v2256_v52  ;;  %v1197_v9 = vrot.slane %v402_v5, %v2228_v27  ;;  %v70_v5 = vld [vmem:[%s2956_s0 + $0x1d0] sm:$0xff] }
  0xb6   :  { %v337_v50 = vsel %vm162_vm0, %v70_v5, -inf }
  0xb7   :  { %v1282_v13 = vsel %vm812_vm5, %v1281_v8, %v1277_v55  ;;  %v1198_v15 = vsel %vm805_vm4, %v1197_v9, %v1193_v56  ;;  %335 = vmax.xlane.f32.xlu1 %v334_v6  ;;  %284 = vmax.xlane.f32.xlu0 %v283_v7  ;;  %v583_v55 = vsel %vm162_vm0, %v152_v46, -inf  ;;  %v580_v56 = vsel %vm162_vm0, %v151_v47, -inf  ;;  %v53_v6 = vld [vmem:[%s2956_s0 + $0x148] sm:$0xff] }
  0xb8   :  { %v231_v16 = vpop.xlane.xlu1 %230  ;;  %v180_v17 = vpop.xlane.xlu0 %179 }
  0xb9   :  { %v916_v20 = vrot.slane %v231_v16, %v2285_v10  ;;  %v811_v21 = vrot.slane %v180_v17, %v2256_v52  ;;  %v101_v17 = vld [vmem:[%s2956_s0 + $0x2c8] sm:$0xff] }
  0xba   :  { %v430_v22 = vsel %vm162_vm0, %v101_v17, -inf }
  0xbb   :  { %v917_v26 = vsel %vm819_vm6, %v916_v20, %v912_v2  ;;  %v813_v30 = vsel %vm812_vm5, %v811_v21, %v806_v3  ;;  %359 = vmax.xlane.f32.xlu1 %v358_v18  ;;  %356 = vmax.xlane.f32.xlu0 %v355_v19  ;;  %v205_v2 = vsel %vm162_vm0, %v26_v61, -inf  ;;  %v78_v18 = vld [vmem:[%s2956_s0 + $0x210] sm:$0xff] }
  0xbc   :  { %v312_v31 = vpop.xlane.xlu1 %311  ;;  %v309_v32 = vpop.xlane.xlu0 %308  ;;  %v361_v23 = vsel %vm162_vm0, %v78_v18, -inf }
  0xbd   :  { %v1049_v35 = vrot.slane %v312_v31, %v2146_v25  ;;  %v1045_v36 = vrot.slane %v309_v32, %v2143_v24  ;;  %v128_v31 = vld [vmem:[%s2956_s0 + $0x3a0] sm:$0xff]  ;;  %v118_v32 = vld [vmem:[%s2956_s0 + $0x350] sm:$0xff] }
  0xbe   :  { %v511_v37 = vsel %vm162_vm0, %v128_v31, -inf  ;;  %v481_v38 = vsel %vm162_vm0, %v118_v32, -inf }
  0xbf   :  { %v1050_v39 = vsel %vm784_vm1, %v1049_v35, %v1045_v36  ;;  %479 = vmax.xlane.f32.xlu1 %v478_v33  ;;  %428 = vmax.xlane.f32.xlu0 %v427_v34 }
  0xc0   :  { %v456_v40 = vpop.xlane.xlu1 %455  ;;  %v405_v41 = vpop.xlane.xlu0 %404 }
  0xc1   :  { %v1286_v44 = vrot.slane %v456_v40, %v2285_v10  ;;  %v1202_v45 = vrot.slane %v405_v41, %v2256_v52  ;;  %v153_v41 = vld [vmem:[%s2956_s0 + $0x468] sm:$0xff] }
  0xc2   :  { %v586_v46 = vsel %vm162_vm0, %v153_v41, -inf }
  0xc3   :  { %v1287_v49 = vsel %vm819_vm6, %v1286_v44, %v1282_v13  ;;  %v1203_v51 = vsel %vm812_vm5, %v1202_v45, %v1198_v15  ;;  %560 = vmax.xlane.f32.xlu1 %v559_v42  ;;  %509 = vmax.xlane.f32.xlu0 %v508_v43  ;;  %v286_v13 = vsel %vm162_vm0, %v53_v6, -inf  ;;  %v145_v42 = vld [vmem:[%s2956_s0 + $0x428] sm:$0xff] }
  0xc4   :  { %v537_v53 = vpop.xlane.xlu1 %536  ;;  %v534_v54 = vpop.xlane.xlu0 %533  ;;  %v562_v47 = vsel %vm162_vm0, %v145_v42, -inf  ;;  %v72_v42 = vld [vmem:[%s2956_s0 + $0x1e0] sm:$0xff] }
  0xc5   :  { %v1419_v57 = vrot.slane %v537_v53, %v2146_v25  ;;  %v1415_v58 = vrot.slane %v534_v54, %v2143_v24 }
  0xc7   :  { %v1420_v62 = vsel %vm784_vm1, %v1419_v57, %v1415_v58  ;;  %584 = vmax.xlane.f32.xlu1 %v583_v55  ;;  %581 = vmax.xlane.f32.xlu0 %v580_v56  ;;  %v27_v55 = vld [vmem:[%s2956_s0 + $0x78] sm:$0xff] }
  0xc8   :  { %v234_v63 = vpop.xlane.xlu1 %233  ;;  %v183_v0 = vpop.xlane.xlu0 %182 }
  0xc9   :  { %v921_v3 = vrot.slane %v234_v63, %v2336_v59  ;;  %v818_v4 = vrot.slane %v183_v0, %v2285_v10  ;;  %v208_v63 = vsel %vm162_vm0, %v27_v55, -inf  ;;  %v80_v55 = vld [vmem:[%s2956_s0 + $0x220] sm:$0xff] }
  0xcb   :  { %v922_v7 = vsel %vm826_vm7, %v921_v3, %v917_v26  ;;  %v820_v8 = vsel %vm819_vm6, %v818_v4, %v813_v30  ;;  %257 = vmax.xlane.f32.xlu1 %v256_v1  ;;  %206 = vmax.xlane.f32.xlu0 %v205_v2  ;;  %v79_v2 = vld [vmem:[%s2956_s0 + $0x218] sm:$0xff] }
  0xcc   :  { %v264_v9 = vpop.xlane.xlu1 %263  ;;  %v261_v12 = vpop.xlane.xlu0 %260 }
  0xcd   :  { %v970_v15 = vrot.slane %v264_v9, %v2146_v25  ;;  %v966_v16 = vrot.slane %v261_v12, %v2143_v24  ;;  %v364_v9 = vsel %vm162_vm0, %v79_v2, -inf }
  0xcf   :  { %v2368_v19 = vsel %vm784_vm1, %v970_v15, %v966_v16  ;;  %338 = vmax.xlane.f32.xlu1 %v337_v50  ;;  %287 = vmax.xlane.f32.xlu0 %v286_v13  ;;  %v129_v15 = vld [vmem:[%s2956_s0 + $0x3a8] sm:$0xff] }
  0xd0   :  { %v408_v20 = vpop.xlane.xlu1 %407  ;;  %v315_v21 = vpop.xlane.xlu0 %314 }
  0xd1   :  { %v1207_v26 = vrot.slane %v408_v20, %v2285_v10  ;;  %v1054_v30 = vrot.slane %v315_v21, %v2155_v28  ;;  %v514_v20 = vsel %vm162_vm0, %v129_v15, -inf }
  0xd3   :  { %v2381_v33 = vsel %vm819_vm6, %v1207_v26, %v1203_v51  ;;  %v1055_v34 = vsel %vm791_vm2, %v1054_v30, %v1050_v39  ;;  %431 = vmax.xlane.f32.xlu1 %v430_v22  ;;  %362 = vmax.xlane.f32.xlu0 %v361_v23  ;;  %v828_v39 = vadd.s32 4294967232, %v2124_v11  ;;  %v154_v26 = vld [vmem:[%s2956_s0 + $0x470] sm:$0xff]  ;;  %v835_v30 = vadd.s32 4294967224, %v2124_v11 }
  0xd4   :  { %v486_v35 = vpop.xlane.xlu1 %485  ;;  %v459_v36 = vpop.xlane.xlu0 %458 }
  0xd5   :  { %v1291_v40 = vrot.slane %v459_v36, %v2336_v59  ;;  %v1336_v48 = vrot.slane %v486_v35, %v2143_v24  ;;  %v2401_v54 = vsub.s32 %v828_v39, %v2128_v14  ;;  %v589_v36 = vsel %vm162_vm0, %v154_v26, -inf }
  0xd6   :  { %v2455_v41 = vsub.s32 %v835_v30, %v2128_v14 }
  0xd7   :  { %v1292_v43 = vsel %vm826_vm7, %v1291_v40, %v1287_v49  ;;  %512 = vmax.xlane.f32.xlu1 %v511_v37  ;;  %482 = vmax.xlane.f32.xlu0 %v481_v38  ;;  %v54_v49 = vld [vmem:[%s2956_s0 + $0x150] sm:$0xff] }
  0xd8   :  { %v540_v44 = vpop.xlane.xlu1 %539  ;;  %v489_v45 = vpop.xlane.xlu0 %488  ;;  %v289_v61 = vsel %vm162_vm0, %v54_v49, -inf  ;;  %v130_v49 = vld [vmem:[%s2956_s0 + $0x3b0] sm:$0xff] }
  0xd9   :  { %v1424_v51 = vrot.slane %v540_v44, %v2155_v28  ;;  %v1340_v53 = vrot.slane %v489_v45, %v2146_v25 }
  0xdb   :  { %v1425_v56 = vsel %vm791_vm2, %v1424_v51, %v1420_v62  ;;  %v1341_v57 = vsel %vm784_vm1, %v1340_v53, %v1336_v48  ;;  %587 = vmax.xlane.f32.xlu1 %v586_v46  ;;  %563 = vmax.xlane.f32.xlu0 %v562_v47  ;;  %v71_v62 = vld [vmem:[%s2956_s0 + $0x1d8] sm:$0xff]  ;;  %v343_v46 = vsel %vm162_vm0, %v72_v42, -inf  ;;  %v619_v48 = vld [vmem:[%s2957_s1 + $0x30] sm:$0x3] }
  0xdc   :  { %v237_v58 = vpop.xlane.xlu1 %236  ;;  %v186_v60 = vpop.xlane.xlu0 %185  ;;  %v340_v12 = vsel %vm162_vm0, %v71_v62, -inf  ;;  %1592 = vmatprep.subr.mxu0 %v619_v48 }
  0xdd   :  { %v926_v0 = vrot.slane %v237_v58, %v2401_v54  ;;  %v825_v1 = vrot.slane %v186_v60, %v2336_v59 }
  0xdf   :  { %v927_v3 = vsel %vm833_vm8, %v926_v0, %v922_v7  ;;  %v827_v4 = vsel %vm826_vm7, %v825_v1, %v820_v8  ;;  %290 = vmax.xlane.f32.xlu1 %v289_v61  ;;  %209 = vmax.xlane.f32.xlu0 %v208_v63  ;;  %v102_v7 = vld [vmem:[%s2956_s0 + $0x2d0] sm:$0xff]  ;;  %v517_v63 = vsel %vm162_vm0, %v130_v49, -inf  ;;  %v367_v0 = vsel %vm162_vm0, %v80_v55, -inf  ;;  %v614_v1 = vld [vmem:[%s2957_s1 + $0x8] sm:$0xff] }
  0xe0   :  { %v318_v5 = vpop.xlane.xlu1 %317  ;;  %v267_v6 = vpop.xlane.xlu0 %266  ;;  %v433_v21 = vsel %vm162_vm0, %v102_v7, -inf }
  0xe1   :  { %v1059_v50 = vrot.slane %v318_v5, %v2158_v29  ;;  %v975_v13 = vrot.slane %v267_v6, %v2155_v28  ;;  %v613_v5 = vld [vmem:[%s2957_s1] sm:$0xff] }
  0xe3   :  { %v1060_v8 = vsel %vm798_vm3, %v1059_v50, %v1055_v34  ;;  %v976_v16 = vsel %vm791_vm2, %v975_v13, %v2368_v19  ;;  %365 = vmax.xlane.f32.xlu1 %v364_v9  ;;  %341 = vmax.xlane.f32.xlu0 %v340_v12  ;;  %v146_v19 = vld [vmem:[%s2956_s0 + $0x430] sm:$0xff] }
  0xe4   :  { %v462_v17 = vpop.xlane.xlu1 %461  ;;  %v411_v18 = vpop.xlane.xlu0 %410  ;;  %v565_v37 = vsel %vm162_vm0, %v146_v19, -inf }
  0xe5   :  { %v1296_v22 = vrot.slane %v462_v17, %v2401_v54  ;;  %v1212_v23 = vrot.slane %v411_v18, %v2336_v59  ;;  %v73_v18 = vld [vmem:[%s2956_s0 + $0x1e8] sm:$0xff] }
  0xe6   :  { %v346_v26 = vsel %vm162_vm0, %v73_v18, -inf }
  0xe7   :  { %v1297_v31 = vsel %vm833_vm8, %v1296_v22, %v1292_v43  ;;  %v1213_v32 = vsel %vm826_vm7, %v1212_v23, %v2381_v33  ;;  %515 = vmax.xlane.f32.xlu1 %v514_v20  ;;  %434 = vmax.xlane.f32.xlu0 %v433_v21  ;;  %v55_v33 = vld [vmem:[%s2956_s0 + $0x158] sm:$0xff] }
  0xe8   :  { %v543_v34 = vpop.xlane.xlu1 %542  ;;  %v492_v35 = vpop.xlane.xlu0 %491  ;;  %v292_v47 = vsel %vm162_vm0, %v55_v33, -inf }
  0xe9   :  { %v1429_v38 = vrot.slane %v543_v34, %v2158_v29  ;;  %v1345_v40 = vrot.slane %v492_v35, %v2155_v28 }
  0xeb   :  { %v1430_v39 = vsel %vm798_vm3, %v1429_v38, %v1425_v56  ;;  %v1346_v43 = vsel %vm791_vm2, %v1345_v40, %v1341_v57  ;;  %590 = vmax.xlane.f32.xlu1 %v589_v36  ;;  %566 = vmax.xlane.f32.xlu0 %v565_v37  ;;  %v618_v56 = vld [vmem:[%s2957_s1 + $0x28] sm:$0x3] }
  0xec   :  { %v240_v44 = vpop.xlane.xlu1 %239  ;;  %v189_v45 = vpop.xlane.xlu0 %188  ;;  %1593 = vmatpush1.xpose.msra.mxu0 %v618_v56 }
  0xed   :  { %v931_v51 = vrot.slane %v240_v44, %v2455_v41  ;;  %v832_v53 = vrot.slane %v189_v45, %v2401_v54  ;;  %1594 = vmatprep.subr.mxu0 %v614_v1 }
  0xef   :  { %v932_v57 = vsel %vm840_vm9, %v931_v51, %v927_v3  ;;  %v834_v58 = vsel %vm833_vm8, %v832_v53, %v827_v4  ;;  %344 = vmax.xlane.f32.xlu1 %v343_v46  ;;  %293 = vmax.xlane.f32.xlu0 %v292_v47  ;;  %v155_v3 = vld [vmem:[%s2956_s0 + $0x478] sm:$0xff]  ;;  %v156_v46 = vld [vmem:[%s2956_s0 + $0x480] sm:$0xff] }
  0xf0   :  { %v321_v60 = vpop.xlane.xlu1 %320  ;;  %v270_v61 = vpop.xlane.xlu0 %269  ;;  %v147_v4 = vld [vmem:[%s2956_s0 + $0x438] sm:$0xff]  ;;  %1595 = vmatpush1.xpose.msra.mxu0 %v613_v5  ;;  %v592_v13 = vsel %vm162_vm0, %v155_v3, -inf  ;;  %v595_v53 = vsel %vm162_vm0, %v156_v46, -inf  ;;  %v82_v5 = vld [vmem:[%s2956_s0 + $0x230] sm:$0xff] }
  0xf1   :  { %v1064_v2 = vrot.slane %v321_v60, %v2228_v27  ;;  %v980_v62 = vrot.slane %v270_v61, %v2158_v29  ;;  %v568_v15 = vsel %vm162_vm0, %v147_v4, -inf  ;;  %v74_v60 = vld [vmem:[%s2956_s0 + $0x1f0] sm:$0xff]  ;;  %v132_v4 = vld [vmem:[%s2956_s0 + $0x3c0] sm:$0xff] }
  0xf2   :  { %v349_v1 = vsel %vm162_vm0, %v74_v60, -inf }
  0xf3   :  { %v1065_v6 = vsel %vm805_vm4, %v1064_v2, %v1060_v8  ;;  %v981_v9 = vsel %vm798_vm3, %v980_v62, %v976_v16  ;;  %518 = vmax.xlane.f32.xlu1 %v517_v63  ;;  %368 = vmax.xlane.f32.xlu0 %v367_v0  ;;  %v56_v8 = vld [vmem:[%s2956_s0 + $0x160] sm:$0xff]  ;;  %v842_v16 = vadd.s32 4294967216, %v2124_v11 }
  0xf4   :  { %v465_v12 = vpop.xlane.xlu1 %464  ;;  %v414_v50 = vpop.xlane.xlu0 %413  ;;  %v295_v19 = vsel %vm162_vm0, %v56_v8, -inf }
  0xf5   :  { %v1301_v7 = vrot.slane %v465_v12, %v2455_v41  ;;  %v1217_v17 = vrot.slane %v414_v50, %v2401_v54  ;;  %v2519_v35 = vsub.s32 %v842_v16, %v2128_v14  ;;  %v157_v16 = vld [vmem:[%s2956_s0 + $0x488] sm:$0xff] }
  0xf7   :  { %v1302_v20 = vsel %vm840_vm9, %v1301_v7, %v1297_v31  ;;  %v1218_v21 = vsel %vm833_vm8, %v1217_v17, %v1213_v32  ;;  %593 = vmax.xlane.f32.xlu1 %v592_v13  ;;  %569 = vmax.xlane.f32.xlu0 %v568_v15  ;;  %v131_v31 = vld [vmem:[%s2956_s0 + $0x3b8] sm:$0xff]  ;;  %v81_v32 = vld [vmem:[%s2956_s0 + $0x228] sm:$0xff]  ;;  %v523_v15 = vsel %vm162_vm0, %v132_v4, -inf  ;;  %v373_v7 = vsel %vm162_vm0, %v82_v5, -inf }
  0xf8   :  { %v546_v22 = vpop.xlane.xlu1 %545  ;;  %v495_v23 = vpop.xlane.xlu0 %494  ;;  %v520_v42 = vsel %vm162_vm0, %v131_v31, -inf  ;;  %v370_v33 = vsel %vm162_vm0, %v81_v32, -inf  ;;  %v75_v32 = vld [vmem:[%s2956_s0 + $0x1f8] sm:$0xff] }
  0xf9   :  { %v1434_v30 = vrot.slane %v546_v22, %v2228_v27  ;;  %v1350_v34 = vrot.slane %v495_v23, %v2158_v29 }
  0xfb   :  { %v1435_v36 = vsel %vm805_vm4, %v1434_v30, %v1430_v39  ;;  %v1351_v37 = vsel %vm798_vm3, %v1350_v34, %v1346_v43  ;;  %347 = vmax.xlane.f32.xlu1 %v346_v26  ;;  %296 = vmax.xlane.f32.xlu0 %v295_v19  ;;  %v148_v39 = vld [vmem:[%s2956_s0 + $0x440] sm:$0xff]  ;;  %v598_v19 = vsel %vm162_vm0, %v157_v16, -inf }
  0xfc   :  { %v243_v38 = vpop.xlane.xlu1 %242  ;;  %v192_v40 = vpop.xlane.xlu0 %191  ;;  %v571_v49 = vsel %vm162_vm0, %v148_v39, -inf  ;;  %v133_v39 = vld [vmem:[%s2956_s0 + $0x3c8] sm:$0xff] }
  0xfd   :  { %v936_v44 = vrot.slane %v243_v38, %v2519_v35  ;;  %v839_v45 = vrot.slane %v192_v40, %v2455_v41 }
  0xff   :  { %v937_v43 = vsel %vm847_vm10, %v936_v44, %v932_v57  ;;  %v841_v47 = vsel %vm840_vm9, %v839_v45, %v834_v58  ;;  %521 = vmax.xlane.f32.xlu1 %v520_v42  ;;  %371 = vmax.xlane.f32.xlu0 %v370_v33  ;;  %v57_v57 = vld [vmem:[%s2956_s0 + $0x168] sm:$0xff]  ;;  %v352_v33 = vsel %vm162_vm0, %v75_v32, -inf }
 0x100   :  { %v324_v48 = vpop.xlane.xlu1 %323  ;;  %v273_v51 = vpop.xlane.xlu0 %272  ;;  %v298_v2 = vsel %vm162_vm0, %v57_v57, -inf  ;;  %v158_v57 = vld [vmem:[%s2956_s0 + $0x490] sm:$0xff] }
 0x101   :  { %v1069_v55 = vrot.slane %v324_v48, %v2256_v52  ;;  %v985_v56 = vrot.slane %v273_v51, %v2228_v27 }
 0x103   :  { %v1070_v58 = vsel %vm812_vm5, %v1069_v55, %v1065_v6  ;;  %v986_v61 = vsel %vm805_vm4, %v985_v56, %v981_v9  ;;  %596 = vmax.xlane.f32.xlu1 %v595_v53  ;;  %572 = vmax.xlane.f32.xlu0 %v571_v49  ;;  %v849_v6 = vadd.s32 4294967208, %v2124_v11  ;;  %v526_v49 = vsel %vm162_vm0, %v133_v39, -inf }
 0x104   :  { %v468_v63 = vpop.xlane.xlu1 %467  ;;  %v417_v0 = vpop.xlane.xlu0 %416 }
 0x105   :  { %v1306_v62 = vrot.slane %v468_v63, %v2519_v35  ;;  %v1222_v3 = vrot.slane %v417_v0, %v2455_v41  ;;  %v2571_v8 = vsub.s32 %v849_v6, %v2128_v14 }
 0x107   :  { %v1307_v9 = vsel %vm847_vm10, %v1306_v62, %v1302_v20  ;;  %v1223_v12 = vsel %vm840_vm9, %v1222_v3, %v1218_v21  ;;  %350 = vmax.xlane.f32.xlu1 %v349_v1  ;;  %299 = vmax.xlane.f32.xlu0 %v298_v2  ;;  %v149_v20 = vld [vmem:[%s2956_s0 + $0x448] sm:$0xff]  ;;  %v601_v62 = vsel %vm162_vm0, %v158_v57, -inf }
 0x108   :  { %v549_v50 = vpop.xlane.xlu1 %548  ;;  %v498_v13 = vpop.xlane.xlu0 %497  ;;  %v574_v30 = vsel %vm162_vm0, %v149_v20, -inf }
 0x109   :  { %v1439_v17 = vrot.slane %v549_v50, %v2256_v52  ;;  %v1355_v18 = vrot.slane %v498_v13, %v2228_v27 }
 0x10b   :  { %v1440_v21 = vsel %vm812_vm5, %v1439_v17, %v1435_v36  ;;  %v1356_v22 = vsel %vm805_vm4, %v1355_v18, %v1351_v37  ;;  %524 = vmax.xlane.f32.xlu1 %v523_v15  ;;  %374 = vmax.xlane.f32.xlu0 %v373_v7  ;;  %v58_v36 = vld [vmem:[%s2956_s0 + $0x170] sm:$0xff] }
 0x10c   :  { %v246_v23 = vpop.xlane.xlu1 %245  ;;  %v195_v26 = vpop.xlane.xlu0 %194  ;;  %v301_v44 = vsel %vm162_vm0, %v58_v36, -inf }
 0x10d   :  { %v941_v34 = vrot.slane %v246_v23, %v2571_v8  ;;  %v846_v31 = vrot.slane %v195_v26, %v2519_v35  ;;  %v159_v23 = vld [vmem:[%s2956_s0 + $0x498] sm:$0xff] }
 0x10f   :  { %v942_v37 = vsel %vm854_vm11, %v941_v34, %v937_v43  ;;  %v848_v38 = vsel %vm847_vm10, %v846_v31, %v841_v47  ;;  %599 = vmax.xlane.f32.xlu1 %v598_v19  ;;  %575 = vmax.xlane.f32.xlu0 %v574_v30  ;;  %v83_v43 = vld [vmem:[%s2956_s0 + $0x238] sm:$0xff]  ;;  %v604_v34 = vsel %vm162_vm0, %v159_v23, -inf }
 0x110   :  { %v327_v40 = vpop.xlane.xlu1 %326  ;;  %v276_v42 = vpop.xlane.xlu0 %275  ;;  %v376_v55 = vsel %vm162_vm0, %v83_v43, -inf  ;;  %v161_v43 = vld [vmem:[%s2956_s0 + $0x4a8] sm:$0xff] }
 0x111   :  { %v1074_v45 = vrot.slane %v327_v40, %v2285_v10  ;;  %v990_v46 = vrot.slane %v276_v42, %v2256_v52  ;;  %v160_v40 = vld [vmem:[%s2956_s0 + $0x4a0] sm:$0xff] }
 0x113   :  { %v1075_v47 = vsel %vm819_vm6, %v1074_v45, %v1070_v58  ;;  %v991_v48 = vsel %vm812_vm5, %v990_v46, %v986_v61  ;;  %353 = vmax.xlane.f32.xlu1 %v352_v33  ;;  %302 = vmax.xlane.f32.xlu0 %v301_v44  ;;  %v150_v58 = vld [vmem:[%s2956_s0 + $0x450] sm:$0xff]  ;;  %v856_v61 = vadd.s32 4294967200, %v2124_v11  ;;  %v607_v45 = vsel %vm162_vm0, %v160_v40, -inf }
 0x114   :  { %v471_v51 = vpop.xlane.xlu1 %470  ;;  %v420_v53 = vpop.xlane.xlu0 %419  ;;  %v577_v3 = vsel %vm162_vm0, %v150_v58, -inf  ;;  %v620_v58 = vld [vmem:[%s2957_s1 + $0x38] sm:$0x3] }
 0x115   :  { %v1311_v56 = vrot.slane %v471_v51, %v2571_v8  ;;  %v1227_v60 = vrot.slane %v420_v53, %v2519_v35  ;;  %v2625_v6 = vsub.s32 %v856_v61, %v2128_v14 }
 0x117   :  { %v2617_v63 = vsel %vm854_vm11, %v1311_v56, %v1307_v9  ;;  %v1228_v0 = vsel %vm847_vm10, %v1227_v60, %v1223_v12  ;;  %527 = vmax.xlane.f32.xlu1 %v526_v49  ;;  %377 = vmax.xlane.f32.xlu0 %v376_v55  ;;  %v84_v9 = vld [vmem:[%s2956_s0 + $0x240] sm:$0xff]  ;;  %v59_v12 = vld [vmem:[%s2956_s0 + $0x178] sm:$0xff]  ;;  %v610_v49 = vsel %vm162_vm0, %v161_v43, -inf }
 0x118   :  { %v552_v1 = vpop.xlane.xlu1 %551  ;;  %v501_v2 = vpop.xlane.xlu0 %500  ;;  %v379_v17 = vsel %vm162_vm0, %v84_v9, -inf  ;;  %v304_v18 = vsel %vm162_vm0, %v59_v12, -inf  ;;  %v621_v56 = vld [vmem:[%s2957_s1 + $0x40] sm:$0x3] }
 0x119   :  { %v1444_v4 = vrot.slane %v552_v1, %v2285_v10  ;;  %v1360_v5 = vrot.slane %v501_v2, %v2256_v52  ;;  %1662 = vmatprep.subr.mxu1 %v621_v56 }
 0x11a   :  { %1663 = vmatpush1.xpose.msra.mxu1 %v620_v58 }
 0x11b   :  { %v1445_v50 = vsel %vm819_vm6, %v1444_v4, %v1440_v21  ;;  %v1361_v13 = vsel %vm812_vm5, %v1360_v5, %v1356_v22  ;;  %602 = vmax.xlane.f32.xlu1 %v601_v62  ;;  %578 = vmax.xlane.f32.xlu0 %v577_v3  ;;  %v134_v21 = vld [vmem:[%s2956_s0 + $0x3d0] sm:$0xff]  ;;  %v616_v62 = vld [vmem:[%s2957_s1 + $0x18] sm:$0xff] }
 0x11c   :  { %v249_v15 = vpop.xlane.xlu1 %248  ;;  %v198_v7 = vpop.xlane.xlu0 %197  ;;  %v529_v31 = vsel %vm162_vm0, %v134_v21, -inf  ;;  %1664 = vmatprep.subr.mxu1 %v616_v62  ;;  %v615_v4 = vld [vmem:[%s2957_s1 + $0x10] sm:$0xff] }
 0x11d   :  { %v946_v16 = vrot.slane %v249_v15, %v2625_v6  ;;  %v853_v20 = vrot.slane %v198_v7, %v2571_v8  ;;  %v1828_v15 = vmov 0.0  }
 0x11e   :  { %1665 = vmatpush1.xpose.msra.mxu1 %v615_v4  ;;  %1796 = vmatprep.subr.mxu0 %v1828_v15 }
 0x11f   :  { %v2646_v22 = vsel %vm861_vm12, %v946_v16, %v942_v37  ;;  %v855_v26 = vsel %vm854_vm11, %v853_v20, %v848_v38  ;;  %380 = vmax.xlane.f32.xlu1 %v379_v17  ;;  %305 = vmax.xlane.f32.xlu0 %v304_v18  ;;  %v85_v37 = vld [vmem:[%s2956_s0 + $0x248] sm:$0xff] }
 0x120   :  { %v330_v19 = vpop.xlane.xlu1 %329  ;;  %v279_v30 = vpop.xlane.xlu0 %278  ;;  %v382_v46 = vsel %vm162_vm0, %v85_v37, -inf }
 0x121   :  { %v1079_v32 = vrot.slane %v330_v19, %v2336_v59  ;;  %v995_v36 = vrot.slane %v279_v30, %v2285_v10 }
 0x123   :  { %v1080_v38 = vsel %vm826_vm7, %v1079_v32, %v1075_v47  ;;  %v996_v42 = vsel %vm819_vm6, %v995_v36, %v991_v48  ;;  %605 = vmax.xlane.f32.xlu1 %v604_v34  ;;  %530 = vmax.xlane.f32.xlu0 %v529_v31  ;;  %v86_v47 = vld [vmem:[%s2956_s0 + $0x250] sm:$0xff] }
 0x124   :  { %v2661_v33 = vpop.xlane.xlu1 %473  ;;  %v423_v44 = vpop.xlane.xlu0 %422  ;;  %v385_v55 = vsel %vm162_vm0, %v86_v47, -inf  ;;  %vm1545_vm0 = vcmask 1041409  }
 0x125   :  { %v1232_v39 = vrot.slane %v423_v44, %v2571_v8 }
 0x127   :  { %v2673_v48 = vsel %vm854_vm11, %v1232_v39, %v1228_v0  ;;  %608 = vmax.xlane.f32.xlu1 %v607_v45  ;;  %383 = vmax.xlane.f32.xlu0 %v382_v46 }
 0x128   :  { %v555_v51 = vpop.xlane.xlu1 %554  ;;  %v504_v53 = vpop.xlane.xlu0 %503 }
 0x129   :  { %v1449_v60 = vrot.slane %v555_v51, %v2336_v59  ;;  %v1365_v57 = vrot.slane %v504_v53, %v2285_v10 }
 0x12b   :  { %v1450_v61 = vsel %vm826_vm7, %v1449_v60, %v1445_v50  ;;  %v1366_v0 = vsel %vm819_vm6, %v1365_v57, %v1361_v13  ;;  %611 = vmax.xlane.f32.xlu1 %v610_v49  ;;  %386 = vmax.xlane.f32.xlu0 %v385_v55 }
 0x12c   :  { %v2687_v1 = vpop.xlane.xlu1 %251  ;;  %v201_v2 = vpop.xlane.xlu0 %200 }
 0x12d   :  { %v860_v3 = vrot.slane %v201_v2, %v2625_v6 }
 0x12f   :  { %v2697_v5 = vsel %vm861_vm12, %v860_v3, %v855_v26 }
 0x130   :  { %v333_v9 = vpop.xlane.xlu1 %332  ;;  %v282_v12 = vpop.xlane.xlu0 %281 }
 0x131   :  { %v1084_v50 = vrot.slane %v333_v9, %v2401_v54  ;;  %v1000_v13 = vrot.slane %v282_v12, %v2336_v59  ;;  %v863_v9 = vadd.s32 4294967192, %v2124_v11  ;;  %v870_v12 = vadd.s32 4294967184, %v2124_v11 }
 0x133   :  { %v1085_v7 = vsel %vm833_vm8, %v1084_v50, %v1080_v38  ;;  %v1001_v17 = vsel %vm826_vm7, %v1000_v13, %v996_v42  ;;  %v877_v50 = vadd.s32 4294967176, %v2124_v11 }
 0x134   :  { %v2704_v18 = vpop.xlane.xlu1 %476  ;;  %v2706_v16 = vpop.xlane.xlu0 %425 }
 0x138   :  { %v558_v20 = vpop.xlane.xlu1 %557  ;;  %v507_v23 = vpop.xlane.xlu0 %506 }
 0x139   :  { %v1454_v21 = vrot.slane %v558_v20, %v2401_v54  ;;  %v1370_v26 = vrot.slane %v507_v23, %v2336_v59  ;;  %v2745_v20 = vsub.s32 %v870_v12, %v2128_v14  ;;  %v2748_v23 = vsub.s32 %v877_v50, %v2128_v14 }
 0x13b   :  { %v1455_v19 = vsel %vm833_vm8, %v1454_v21, %v1450_v61  ;;  %v1371_v30 = vsel %vm826_vm7, %v1370_v26, %v1366_v0  ;;  %v1316_v26 = vrot.slane %v2661_v33, %v2625_v6 }
 0x13c   :  { %v2712_v34 = vpop.xlane.xlu1 %254  ;;  %v2714_v31 = vpop.xlane.xlu0 %203 }
 0x140   :  { %v336_v32 = vpop.xlane.xlu1 %335  ;;  %v285_v36 = vpop.xlane.xlu0 %284 }
 0x141   :  { %v1089_v40 = vrot.slane %v336_v32, %v2455_v41  ;;  %v1005_v37 = vrot.slane %v285_v36, %v2401_v54 }
 0x143   :  { %v1090_v38 = vsel %vm840_vm9, %v1089_v40, %v1085_v7  ;;  %v1006_v42 = vsel %vm833_vm8, %v1005_v37, %v1001_v17  ;;  %v2740_v17 = vsub.s32 %v863_v9, %v2128_v14  ;;  %v956_v40 = vrot.slane %v2712_v34, %v2745_v20 }
 0x144   :  { %v360_v44 = vpop.xlane.xlu1 %359  ;;  %v357_v45 = vpop.xlane.xlu0 %356 }
 0x145   :  { %v1128_v46 = vrot.slane %v360_v44, %v2146_v25  ;;  %v1124_v39 = vrot.slane %v357_v45, %v2143_v24  ;;  %v951_v32 = vrot.slane %v2687_v1, %v2740_v17  ;;  %v1321_v36 = vrot.slane %v2704_v18, %v2740_v17 }
 0x146   :  { %v867_v9 = vrot.slane %v2714_v31, %v2740_v17 }
 0x147   :  { %v1129_v43 = vsel %vm784_vm1, %v1128_v46, %v1124_v39  ;;  %v952_v18 = vsel %vm868_vm13, %v951_v32, %v2646_v22 }
 0x148   :  { %v480_v47 = vpop.xlane.xlu1 %479  ;;  %v2723_v51 = vpop.xlane.xlu0 %428  ;;  %v957_v39 = vsel %vm875_vm14, %v956_v40, %v952_v18  ;;  %v617_v40 = vld [vmem:[%s2957_s1 + $0x20] sm:$0xff] }
 0x149   :  { %v1326_v37 = vrot.slane %v480_v47, %v2745_v20  ;;  %v1242_v12 = vrot.slane %v2723_v51, %v2740_v17  ;;  %v869_v51 = vsel %vm868_vm13, %v867_v9, %v2697_v5 }
 0x14c   :  { %v561_v53 = vpop.xlane.xlu1 %560  ;;  %v510_v49 = vpop.xlane.xlu0 %509 }
 0x14d   :  { %v1459_v55 = vrot.slane %v561_v53, %v2455_v41  ;;  %v1375_v56 = vrot.slane %v510_v49, %v2401_v54 }
 0x14f   :  { %v2728_v60 = vsel %vm840_vm9, %v1459_v55, %v1455_v19  ;;  %v1376_v57 = vsel %vm833_vm8, %v1375_v56, %v1371_v30 }
 0x150   :  { %v585_v58 = vpop.xlane.xlu1 %584  ;;  %v582_v61 = vpop.xlane.xlu0 %581 }
 0x151   :  { %v1498_v0 = vrot.slane %v585_v58, %v2146_v25  ;;  %v1494_v2 = vrot.slane %v582_v61, %v2143_v24 }
 0x153   :  { %v1499_v62 = vsel %vm784_vm1, %v1498_v0, %v1494_v2  ;;  %vm1555_vm1 = vcmask 719872  }
 0x154   :  { %v258_v3 = vpop.xlane.xlu1 %257  ;;  %v2734_v4 = vpop.xlane.xlu0 %206 }
 0x158   :  { %v339_v13 = vpop.xlane.xlu1 %338  ;;  %v288_v7 = vpop.xlane.xlu0 %287 }
 0x159   :  { %v1094_v25 = vrot.slane %v339_v13, %v2519_v35  ;;  %v1010_v24 = vrot.slane %v288_v7, %v2455_v41 }
 0x15b   :  { %v2751_v21 = vsel %vm847_vm10, %v1094_v25, %v1090_v38  ;;  %v2754_v11 = vsel %vm840_vm9, %v1010_v24, %v1006_v42  ;;  %v961_v38 = vrot.slane %v258_v3, %v2748_v23  ;;  %v1317_v42 = vsel %vm861_vm12, %v1316_v26, %v2617_v63 }
 0x15c   :  { %v432_v19 = vpop.xlane.xlu1 %431  ;;  %v363_v30 = vpop.xlane.xlu0 %362  ;;  %v1322_v45 = vsel %vm868_vm13, %v1321_v36, %v1317_v42 }
 0x15d   :  { %v1133_v14 = vrot.slane %v363_v30, %v2155_v28  ;;  %v962_v63 = vsel %vm882_vm15, %v961_v38, %v957_v39  ;;  %v1247_v50 = vrot.slane %v432_v19, %v2745_v20 }
 0x15f   :  { %v1134_v33 = vsel %vm791_vm2, %v1133_v14, %v1129_v43  ;;  %v1327_v43 = vsel %vm875_vm14, %v1326_v37, %v1322_v45 }
 0x160   :  { %v513_v1 = vpop.xlane.xlu1 %512  ;;  %v483_v44 = vpop.xlane.xlu0 %482 }
 0x161   :  { %v1380_v34 = vrot.slane %v513_v1, %v2455_v41  ;;  %v1331_v46 = vrot.slane %v483_v44, %v2748_v23 }
 0x163   :  { %v2778_v47 = vsel %vm840_vm9, %v1380_v34, %v1376_v57  ;;  %v1332_v53 = vsel %vm882_vm15, %v1331_v46, %v1327_v43  ;;  %v1237_v57 = vrot.slane %v2706_v16, %v2625_v6 }
 0x164   :  { %v588_v49 = vpop.xlane.xlu1 %587  ;;  %v2782_v55 = vpop.xlane.xlu0 %563  ;;  %v1547_v22 = vsel %vm1545_vm0, %v1332_v53, %v962_v63 }
 0x165   :  { %v1503_v56 = vrot.slane %v588_v49, %v2155_v28  ;;  %1628 = vmatprep.mubr.f32.mxu0 %v1547_v22  ;;  %v1238_v7 = vsel %vm861_vm12, %v1237_v57, %v2673_v48  ;;  %v622_v48 = vld [vmem:[%s2957_s1 + $0x48] sm:$0x3]  ;;  %s1830_s1 = smov [#allocation2]  }
 0x166   :  { %v1243_v24 = vsel %vm868_vm13, %v1242_v12, %v1238_v7  ;;  %s1782_s20 = sshll.u32 %s1830_s1, 4  ;;  %s1783_s20 = int_to_ptr.vmem [resolvable:$true] %s1782_s20 }
 0x167   :  { %v2787_v58 = vsel %vm791_vm2, %v1503_v56, %v1499_v62  ;;  %v874_v62 = vrot.slane %v2734_v4, %v2745_v20  ;;  %v1248_v19 = vsel %vm875_vm14, %v1247_v50, %v1243_v24  ;;  %vm1829_vm2 = vmmov 0   ;;  %s1806_s21 = scalar_lea.vmem %s1783_s20, 32  ;;  %p1811_p1 = scmp.lt.s32.totalorder %s1783_s20, %s1783_s20 }
 0x168   :  { %v2789_v61 = vpop.xlane.xlu1 %290  ;;  %v210_v0 = vpop.xlane.xlu0 %209  ;;  %p1807_p0 = scmp.ne.s32.totalorder %s1783_s20, %s1806_s21  ;;  %p1812_p2 = scmp.lt.s32.totalorder %s1806_s21, %s1806_s21 }
 0x169   :  { %v881_v13 = vrot.slane %v210_v0, %v2748_v23  ;;  %v876_v26 = vsel %vm875_vm14, %v874_v62, %v869_v51 }
 0x16a   :  { %p1813_p3 = por %p1812_p2, %p1811_p1 }
 0x16b   :  { %v883_v30 = vsel %vm882_vm15, %v881_v13, %v876_v26 }
 0x16c   :  { %v366_v2 = vpop.xlane.xlu1 %365  ;;  %v2793_v3 = vpop.xlane.xlu0 %341  ;;  %p1814_p4 = pnand %p1813_p3, %p1807_p0 }
 0x16d   :  { %v1138_v28 = vrot.slane %v366_v2, %v2158_v29  ;;  %v1464_v2 = vrot.slane %v2782_v55, %v2519_v35  ;;  %v1099_v9 = vrot.slane %v2793_v3, %v2571_v8 }
 0x16f   :  { %v2805_v16 = vsel %vm798_vm3, %v1138_v28, %v1134_v33  ;;  %v1465_v51 = vsel %vm847_vm10, %v1464_v2, %v2728_v60  ;;  %v1100_v24 = vsel %vm854_vm11, %v1099_v9, %v2751_v21  ;;  %v1015_v21 = vrot.slane %v2789_v61, %v2519_v35 }
 0x170   :  { %v2809_v25 = vpop.xlane.xlu1 %515  ;;  %v435_v31 = vpop.xlane.xlu0 %434 }
 0x171   :  { %v1252_v4 = vrot.slane %v435_v31, %v2748_v23 }
 0x173   :  { %v1253_v32 = vsel %vm882_vm15, %v1252_v4, %v1248_v19 }
 0x174   :  { %v2822_v36 = vpop.xlane.xlu1 %590  ;;  %v567_v5 = vpop.xlane.xlu0 %566  ;;  %v1546_v14 = vsel %vm1545_vm0, %v1253_v32, %v883_v30 }
 0x175   :  { %1629 = vmatmul.mubr.f32.vlgmr.msra.gmra.mxu0 %v1546_v14  ;;  %v1469_v12 = vrot.slane %v567_v5, %v2571_v8 }
 0x176   :  { %1797 = vmatpush3.xpose.msk.msra.mxu0 %vm1555_vm1, %v622_v48  ;;  %1800 = vmatprep.mubr.msk.f32.mxu0 %vm1829_vm2, %v1828_v15 }
 0x177   :  { %1798 = vmatprep.subr.mxu0 %v1828_v15  ;;  %v1470_v4 = vsel %vm854_vm11, %v1469_v12, %v1465_v51 }
 0x178   :  { %v345_v37 = vpop.xlane.xlu1 %344  ;;  %v2831_v38 = vpop.xlane.xlu0 %293 }
 0x179   :  { %v1104_v28 = vrot.slane %v345_v37, %v2625_v6 }
 0x17a   :  { %1799 = vmatpush3.xpose.msk.msra.mxu0 %vm1555_vm1, %v617_v40  ;;  %v1385_v40 = vrot.slane %v2809_v25, %v2519_v35 }
 0x17b   :  { %v1105_v19 = vsel %vm861_vm12, %v1104_v28, %v1100_v24 }
 0x17c   :  { %v2834_v33 = vpop.xlane.xlu1 %518  ;;  %v2836_v42 = vpop.xlane.xlu0 %368 }
 0x180   :  { %v2838_v1 = vpop.xlane.xlu1 %593  ;;  %v570_v44 = vpop.xlane.xlu0 %569 }
 0x181   :  { %v1474_v62 = vrot.slane %v570_v44, %v2625_v6 }
 0x183   :  { %v1475_v30 = vsel %vm861_vm12, %v1474_v62, %v1470_v4 }
 0x184   :  { %v348_v18 = vpop.xlane.xlu1 %347  ;;  %v297_v45 = vpop.xlane.xlu0 %296 }
 0x185   :  { %v1109_v7 = vrot.slane %v348_v18, %v2740_v17  ;;  %v1020_v18 = vrot.slane %v2831_v38, %v2571_v8  ;;  %v1386_v38 = vsel %vm847_vm10, %v1385_v40, %v2778_v47 }
 0x187   :  { %v1110_v60 = vsel %vm868_vm13, %v1109_v7, %v1105_v19 }
 0x188   :  { %v522_v34 = vpop.xlane.xlu1 %521  ;;  %v2840_v15 = vpop.xlane.xlu0 %371 }
 0x189   :  { %v1395_v61 = vrot.slane %v522_v34, %v2625_v6 }
 0x18c   :  { %v2842_v46 = vpop.xlane.xlu1 %596  ;;  %v573_v39 = vpop.xlane.xlu0 %572 }
 0x18d   :  { %v1479_v31 = vrot.slane %v573_v39, %v2740_v17  ;;  %v1390_v39 = vrot.slane %v2834_v33, %v2571_v8  ;;  %v1016_v8 = vsel %vm847_vm10, %v1015_v21, %v2754_v11 }
 0x18f   :  { %v1480_v5 = vsel %vm868_vm13, %v1479_v31, %v1475_v30  ;;  %v1391_v34 = vsel %vm854_vm11, %v1390_v39, %v1386_v38 }
 0x190   :  { %v351_v43 = vpop.xlane.xlu1 %350  ;;  %v300_v63 = vpop.xlane.xlu0 %299  ;;  %v1396_v47 = vsel %vm861_vm12, %v1395_v61, %v1391_v34 }
 0x191   :  { %v1114_v55 = vrot.slane %v351_v43, %v2745_v20  ;;  %v1030_v12 = vrot.slane %v300_v63, %v2740_v17  ;;  %v1143_v63 = vrot.slane %v2836_v42, %v2228_v27 }
 0x193   :  { %v1115_v37 = vsel %vm875_vm14, %v1114_v55, %v1110_v60 }
 0x194   :  { %v525_v53 = vpop.xlane.xlu1 %524  ;;  %v2844_v49 = vpop.xlane.xlu0 %374 }
 0x195   :  { %v1400_v28 = vrot.slane %v525_v53, %v2740_v17  ;;  %v1508_v17 = vrot.slane %v2822_v36, %v2158_v29  ;;  %v1148_v29 = vrot.slane %v2840_v15, %v2256_v52  ;;  %v1518_v36 = vrot.slane %v2842_v46, %v2256_v52 }
 0x196   :  { %v1153_v55 = vrot.slane %v2844_v49, %v2285_v10 }
 0x197   :  { %v1401_v7 = vsel %vm868_vm13, %v1400_v28, %v1396_v47  ;;  %v1509_v15 = vsel %vm798_vm3, %v1508_v17, %v2787_v58  ;;  %vm1774_vm3 = vcmask 74752  }
 0x198   :  { %v2846_v22 = vpop.xlane.xlu1 %599  ;;  %v576_v56 = vpop.xlane.xlu0 %575 }
 0x199   :  { %v1484_v3 = vrot.slane %v576_v56, %v2745_v20 }
 0x19b   :  { %v1485_v44 = vsel %vm875_vm14, %v1484_v3, %v1480_v5 }
 0x19c   :  { %v354_v0 = vpop.xlane.xlu1 %353  ;;  %v303_v57 = vpop.xlane.xlu0 %302 }
 0x19d   :  { %v1119_v26 = vrot.slane %v354_v0, %v2748_v23  ;;  %v1025_v0 = vrot.slane %v297_v45, %v2625_v6  ;;  %v1035_v33 = vrot.slane %v303_v57, %v2745_v20  ;;  %v1021_v6 = vsel %vm854_vm11, %v1020_v18, %v1016_v8 }
 0x19f   :  { %v1120_v43 = vsel %vm882_vm15, %v1119_v26, %v1115_v37  ;;  %v1026_v11 = vsel %vm861_vm12, %v1025_v0, %v1021_v6 }
 0x1a0   :  { %v528_v50 = vpop.xlane.xlu1 %527  ;;  %v2855_v13 = vpop.xlane.xlu0 %377 }
 0x1a1   :  { %v1405_v45 = vrot.slane %v528_v50, %v2745_v20  ;;  %v1513_v20 = vrot.slane %v2838_v1, %v2228_v27  ;;  %v1031_v50 = vsel %vm868_vm13, %v1030_v12, %v1026_v11  ;;  %v1523_v27 = vrot.slane %v2846_v22, %v2285_v10 }
 0x1a2   :  { %v1036_v42 = vsel %vm875_vm14, %v1035_v33, %v1031_v50  ;;  %v1158_v52 = vrot.slane %v2855_v13, %v2336_v59  ;;  %v1144_v10 = vsel %vm805_vm4, %v1143_v63, %v2805_v16 }
 0x1a3   :  { %v1406_v51 = vsel %vm875_vm14, %v1405_v45, %v1401_v7  ;;  %v1514_v22 = vsel %vm805_vm4, %v1513_v20, %v1509_v15  ;;  %v1149_v58 = vsel %vm812_vm5, %v1148_v29, %v1144_v10 }
 0x1a4   :  { %v2869_v32 = vpop.xlane.xlu1 %602  ;;  %v579_v48 = vpop.xlane.xlu0 %578  ;;  %v1519_v13 = vsel %vm812_vm5, %v1518_v36, %v1514_v22  ;;  %v1154_v30 = vsel %vm819_vm6, %v1153_v55, %v1149_v58 }
 0x1a5   :  { %v1489_v14 = vrot.slane %v579_v48, %v2748_v23  ;;  %v1528_v46 = vrot.slane %v2869_v32, %v2336_v59  ;;  %v1524_v32 = vsel %vm819_vm6, %v1523_v27, %v1519_v13  ;;  %v1159_v16 = vsel %vm826_vm7, %v1158_v52, %v1154_v30 }
 0x1a7   :  { %v1490_v56 = vsel %vm882_vm15, %v1489_v14, %v1485_v44  ;;  %v1529_v48 = vsel %vm826_vm7, %v1528_v46, %v1524_v32 }
 0x1a8   :  { %v381_v2 = vpop.xlane.xlu1 %380  ;;  %v306_v25 = vpop.xlane.xlu0 %305  ;;  %v1549_v9 = vsel %vm1545_vm0, %v1490_v56, %v1120_v43 }
 0x1a9   :  { %1698 = vmatprep.mubr.f32.mxu1 %v1549_v9  ;;  %v1040_v62 = vrot.slane %v306_v25, %v2748_v23  ;;  %v1163_v4 = vrot.slane %v381_v2, %v2401_v54 }
 0x1ab   :  { %v1041_v1 = vsel %vm882_vm15, %v1040_v62, %v1036_v42 }
 0x1ac   :  { %v606_v53 = vpop.xlane.xlu1 %605  ;;  %v531_v57 = vpop.xlane.xlu0 %530 }
 0x1ad   :  { %v1410_v31 = vrot.slane %v531_v57, %v2748_v23  ;;  %v1533_v26 = vrot.slane %v606_v53, %v2401_v54  ;;  %v1164_v54 = vsel %vm833_vm8, %v1163_v4, %v1159_v16 }
 0x1af   :  { %v1411_v23 = vsel %vm882_vm15, %v1410_v31, %v1406_v51  ;;  %v1534_v14 = vsel %vm833_vm8, %v1533_v26, %v1529_v48 }
 0x1b0   :  { %v609_v3 = vpop.xlane.xlu1 %608  ;;  %v384_v24 = vpop.xlane.xlu0 %383  ;;  %v1548_v49 = vsel %vm1545_vm0, %v1411_v23, %v1041_v1 }
 0x1b1   :  { %1699 = vmatmul.mubr.f32.vlgmr.msra.gmra.mxu1 %v1548_v49  ;;  %v1538_v59 = vrot.slane %v609_v3, %v2455_v41  ;;  %v1168_v19 = vrot.slane %v384_v24, %v2455_v41 }
 0x1b3   :  { %v1539_v41 = vsel %vm840_vm9, %v1538_v59, %v1534_v14  ;;  %v1169_v37 = vsel %vm840_vm9, %v1168_v19, %v1164_v54 }
 0x1b4   :  { %v612_v60 = vpop.xlane.xlu1 %611  ;;  %v387_v5 = vpop.xlane.xlu0 %386 }
 0x1b5   :  { %v1543_v21 = vrot.slane %v612_v60, %v2519_v35  ;;  %v1173_v40 = vrot.slane %v387_v5, %v2519_v35 }
 0x1b7   :  { %v1544_v44 = vsel %vm847_vm10, %v1543_v21, %v1539_v41  ;;  %v1174_v18 = vsel %vm847_vm10, %v1173_v40, %v1169_v37 }
 0x1b8   :  { %v1550_v39 = vsel %vm1545_vm0, %v1544_v44, %v1174_v18 }
 0x1b9   :  { %1801 = vmatmul.mubr.msk.f32.vlgmr.msra.gmra.mxu0 %vm1555_vm1, %v1550_v39 }
 0x235   :  { %v1630_v43 = vpop.f32.mrf.mxu0 }
 0x237   :  { %v1632_v56 = vpop.f32.mrf.mxu0 }
 0x271   :  { %v1700_v0 = vpop.f32.mrf.mxu1 }
 0x272   :  { %v1701_v2 = vadd.f32 %v1700_v0, %v1630_v43 }
 0x273   :  { %v1702_v61 = vpop.f32.mrf.mxu1 }
 0x279   :  { %v1770_v35 = vpop.f32.mrf.mxu0 }
 0x27a   :  { %v1771_v25 = vadd.f32 %v1770_v35, %v1701_v2 }
 0x27b   :  { %v1802_v9 = vpop.f32.mrf.mxu0 }
 0x27c   :  { %1775 = vst.msk [vmem:[#allocation2] sm:$0x3] %vm1774_vm3, %v1771_v25 }
 0x27d   :  { %1817 = shalt.err (!%p1814_p4)
}
 0x27e   :  { %1785 = dma.vmem_to_hbm [thread:$0]  %s1783_s20, 32, %s2958_s2, [#allocation3]  }
 0x27f   :  { %1826 = dma.done.wait [#allocation3], 32  }
 0x280   :  { %1827 = vsyncadd [#allocation3], 4294967264 }
 0x281   :  { %1789 = vsyncpa [#allocation3], 1 }

</bundles_post_ra>
